<compile_context>
chip_gen: v7x
topology: tpu7x:2x2x1
jax: 0.10.0
libtpu: 0.0.40
codegen_flags: <defaults>
</compile_context>

<pallas_src>
import functools

import numpy as np
import jax
import jax.numpy as jnp
from jax.experimental import pallas as pl
from jax.experimental.pallas import tpu as pltpu


# ---------------------------------------------------------------------------
# Kernel 1: row-tiled feature transform with folded source-side normalization
#   xw1_scaled = d^{-1/2} * (X @ W1)       (f32 matmul, bf16 output)
# ---------------------------------------------------------------------------
def _linear_scale_kernel(x_ref, w_ref, dinv_ref, o_ref):
    xw = jnp.dot(x_ref[...], w_ref[...], preferred_element_type=jnp.float32)
    o_ref[...] = (dinv_ref[...] * xw).astype(o_ref.dtype)


# ---------------------------------------------------------------------------
# Kernel 2: block-sparse aggregation + bias + relu (layer 1)
#   acc = sum over non-empty K blocks of  S[i, kblk] @ xw1_scaled[kblk]
#   h   = relu(d^{-1/2}_i * acc + b1)
#   out = d^{-1/2}_i * h        (pre-scaled for the next aggregation, bf16)
# ---------------------------------------------------------------------------
def _agg_bias_relu_kernel(bidx_ref, bcnt_ref, s_ref, xw_ref, dinv_ref, b_ref,
                          h_ref, acc_ref):
    i = pl.program_id(0)
    k = pl.program_id(1)

    @pl.when(k == 0)
    def _():
        acc_ref[...] = jnp.zeros_like(acc_ref)

    @pl.when(k < bcnt_ref[i])
    def _():
        acc_ref[...] += jnp.dot(
            s_ref[...].astype(jnp.bfloat16), xw_ref[...],
            preferred_element_type=jnp.float32)

    @pl.when(k == pl.num_programs(1) - 1)
    def _():
        dinv = dinv_ref[...]                                    # [TM, 1] f32 (exact)
        h = jnp.maximum(dinv * acc_ref[...] + b_ref[...], 0.0)
        h_ref[...] = (dinv * h).astype(h_ref.dtype)


# ---------------------------------------------------------------------------
# Kernel 3: block-sparse aggregation (layer 2) + final linear + log_softmax
#   agg = d^{-1/2}_i * sum_k S[i, kblk] @ h_scaled[kblk]
#   z   = agg @ W2_pad + b2_pad ; out = log_softmax(z) over the real classes
# ---------------------------------------------------------------------------
def _agg_lin_logsoftmax_kernel(bidx_ref, bcnt_ref, s_ref, h_ref, dinv_ref,
                               w2_ref, b2_ref, o_ref, acc_ref, *, nclass):
    i = pl.program_id(0)
    k = pl.program_id(1)

    @pl.when(k == 0)
    def _():
        acc_ref[...] = jnp.zeros_like(acc_ref)

    @pl.when(k < bcnt_ref[i])
    def _():
        acc_ref[...] += jnp.dot(
            s_ref[...].astype(jnp.bfloat16), h_ref[...],
            preferred_element_type=jnp.float32)

    @pl.when(k == pl.num_programs(1) - 1)
    def _():
        agg = dinv_ref[...] * acc_ref[...]                      # [TM, H] f32
        z = jnp.dot(agg, w2_ref[...],
                    preferred_element_type=jnp.float32) + b2_ref[...]
        # log_softmax over the first `nclass` lanes only (rest is zero padding);
        # kept in f32 so the -1e30 mask is safe.
        col = jax.lax.broadcasted_iota(jnp.int32, z.shape, 1)
        valid = col < nclass
        zm = jnp.where(valid, z, -1e30)
        m = jnp.max(zm, axis=1, keepdims=True)
        p = jnp.where(valid, jnp.exp(zm - m), 0.0)
        lse = jnp.log(jnp.sum(p, axis=1, keepdims=True)) + m
        o_ref[...] = (z - lse).astype(o_ref.dtype)   # padded lanes sliced off outside


# ---------------------------------------------------------------------------
# Host-side graph preprocessing + wrapper
# ---------------------------------------------------------------------------
def _round_up(n, m):
    return ((n + m - 1) // m) * m


def _pick_tile(n, cap):
    for t in (2048, 1024, 512, 256):
        if t <= cap and n % t == 0:
            return t
    return min(n, cap)


def _preprocess_graph(edge_index, num_nodes, n_pad, tm, tk):
    """Exact 0/1 structure S=(A+I) as int8, d^{-1/2}, blocked-CSR tables.

    Note: symmetrizes and dedupes edges before adding self loops (the usual GCN
    convention for undirected benchmark graphs); PyG's GCNConv sums duplicate
    edges and only adds missing self loops, so results can differ on
    directed/multi-graphs.
    """
    src = np.asarray(edge_index[0]).astype(np.int64)
    dst = np.asarray(edge_index[1]).astype(np.int64)
    s = np.zeros((n_pad, n_pad), np.int8)
    s[src, dst] = 1
    s[dst, src] = 1                               # symmetrize + dedupe
    idx = np.arange(num_nodes)
    s[idx, idx] = 1                               # self loops (real nodes only)
    deg = s.sum(axis=1, dtype=np.float64)
    dinv = np.where(deg > 0, 1.0 / np.sqrt(deg), 0.0).astype(np.float32)

    ri, rk = n_pad // tm, n_pad // tk
    blk = s.reshape(ri, tm, rk, tk).any(axis=(1, 3))            # [ri, rk]
    cnt = blk.sum(axis=1).astype(np.int32)
    kmax = max(int(cnt.max()), 1)
    bidx = np.zeros((ri, kmax), np.int32)
    for i in range(ri):
        nz = np.nonzero(blk[i])[0].astype(np.int32)
        if nz.size == 0:
            nz = np.zeros((1,), np.int32)
        row = np.full((kmax,), nz[-1], np.int32)  # pad w/ last idx -> DMA revisit skipped
        row[: nz.size] = nz
        bidx[i] = row
    return s, dinv, bidx.reshape(-1), cnt, kmax   # bidx flattened (SMEM padding hygiene)


def basic_gnn_forward(x, edge_index, w1, b1, w2, b2, *, tm=None, tk=None):
    N, F = x.shape
    H = w1.shape[1]
    C = w2.shape[1]
    C_PAD = max(128, _round_up(C, 128))           # lane-dense output width

    # Pad N so 256..2048 tiles always divide (no single-huge-block fallback).
    n_pad = _round_up(max(N, 256), 256)
    TM = tm or _pick_tile(n_pad, 1024)
    TK = tk or _pick_tile(n_pad, 2048)            # v6e can take 4096; 2048 fits v7x scoped VMEM
    if tm is None and n_pad // TM < 2 and n_pad >= 512:
        TM = n_pad // 2                           # >= 2 row tiles -> both v7x TCs fed

    s_np, dinv_np, bidx_np, bcnt_np, kmax = _preprocess_graph(
        edge_index, N, n_pad, TM, TK)
    nnz_blocks = max(int(bcnt_np.sum()), 1)

    s = jnp.asarray(s_np)                                     # [Np, Np] int8 (exact 0/1)
    dinv = jnp.asarray(dinv_np).reshape(n_pad, 1)             # [Np, 1]  f32
    bidx = jnp.asarray(bidx_np)                               # [Ri*Kmax] int32 (SMEM prefetch)
    bcnt = jnp.asarray(bcnt_np)                               # [Ri]      int32 (SMEM prefetch)

    x_pad = jnp.zeros((n_pad, F), jnp.float32).at[:N].set(x.astype(jnp.float32))
    w1_f = w1.astype(jnp.float32)
    b1_r = b1.reshape(1, H).astype(jnp.float32)
    w2_pad = jnp.zeros((H, C_PAD), jnp.float32).at[:, :C].set(w2.astype(jnp.float32))
    b2_pad = jnp.zeros((1, C_PAD), jnp.float32).at[0, :C].set(b2.astype(jnp.float32))

    # Scalar-prefetch-driven index maps (block-sparse K sweep).
    def s_map(i, k, bidx_ref, bcnt_ref):
        return (i, bidx_ref[i * kmax + k])

    def rhs_map(i, k, bidx_ref, bcnt_ref):
        return (bidx_ref[i * kmax + k], 0)

    def row_map(i, k, bidx_ref, bcnt_ref):
        return (i, 0)

    def const_map(i, k, bidx_ref, bcnt_ref):
        return (0, 0)

    # Raise scoped VMEM explicitly (v5e default is 16 MiB); cap at v7x physical.
    vmem_needed = (2 * TM * TK * 1                # S tiles, int8, double-buffered
                   + 2 * TK * H * 2               # rhs tiles, bf16, double-buffered
                   + 2 * TM * C_PAD * 4           # widest output tile, f32, double-buffered
                   + TM * H * 4                   # f32 accumulator
                   + 2 * TM * 4 + H * C_PAD * 4 + C_PAD * 4
                   + 4 * TM * C_PAD * 4)          # epilogue temporaries headroom
    vmem_limit = int(min(64 * 1024 * 1024, max(32 * 1024 * 1024, 2 * vmem_needed)))

    # ---- 1) xw1_scaled = d^{-1/2} * (X @ W1) ----
    xw1_scaled = pl.pallas_call(
        _linear_scale_kernel,
        out_shape=jax.ShapeDtypeStruct((n_pad, H), jnp.bfloat16),
        grid_spec=pltpu.PrefetchScalarGridSpec(
            num_scalar_prefetch=0,
            grid=(n_pad // TM,),
            in_specs=[
                pl.BlockSpec((TM, F), lambda i: (i, 0)),
                pl.BlockSpec((F, H), lambda i: (0, 0)),
                pl.BlockSpec((TM, 1), lambda i: (i, 0)),
            ],
            out_specs=pl.BlockSpec((TM, H), lambda i: (i, 0)),
        ),
        compiler_params=pltpu.CompilerParams(
            dimension_semantics=("parallel",)),
        cost_estimate=pl.CostEstimate(
            flops=int(2 * n_pad * F * H + n_pad * H),
            transcendentals=0,
            bytes_accessed=int(4 * n_pad * F + 4 * F * H + 2 * n_pad * H)),
    )(x_pad, w1_f, dinv)

    grid = (n_pad // TM, kmax)
    sem = ("parallel", "arbitrary")

    # ---- 2) h_scaled = d^{-1/2} * relu(A_hat @ XW1 + b1) ----
    h_scaled = pl.pallas_call(
        _agg_bias_relu_kernel,
        out_shape=jax.ShapeDtypeStruct((n_pad, H), jnp.bfloat16),
        grid_spec=pltpu.PrefetchScalarGridSpec(
            num_scalar_prefetch=2,
            grid=grid,
            in_specs=[
                pl.BlockSpec((TM, TK), s_map),
                pl.BlockSpec((TK, H), rhs_map),
                pl.BlockSpec((TM, 1), row_map),
                pl.BlockSpec((1, H), const_map),
            ],
            out_specs=pl.BlockSpec((TM, H), row_map),
            scratch_shapes=[pltpu.VMEM((TM, H), jnp.float32)],
        ),
        compiler_params=pltpu.CompilerParams(
            dimension_semantics=sem, vmem_limit_bytes=vmem_limit),
        cost_estimate=pl.CostEstimate(
            flops=int(2 * nnz_blocks * TM * TK * H + 4 * n_pad * H),
            transcendentals=0,
            bytes_accessed=int(nnz_blocks * (TM * TK + 2 * TK * H)
                               + n_pad * (2 * H + 4) + 4 * H)),
    )(bidx, bcnt, s, xw1_scaled, dinv, b1_r)

    # ---- 3) z = (A_hat @ h) @ W2 + b2 ; masked log_softmax, lane-dense store ----
    out_pad = pl.pallas_call(
        functools.partial(_agg_lin_logsoftmax_kernel, nclass=C),
        out_shape=jax.ShapeDtypeStruct((n_pad, C_PAD), jnp.float32),
        grid_spec=pltpu.PrefetchScalarGridSpec(
            num_scalar_prefetch=2,
            grid=grid,
            in_specs=[
                pl.BlockSpec((TM, TK), s_map),
                pl.BlockSpec((TK, H), rhs_map),
                pl.BlockSpec((TM, 1), row_map),
                pl.BlockSpec((H, C_PAD), const_map),
                pl.BlockSpec((1, C_PAD), const_map),
            ],
            out_specs=pl.BlockSpec((TM, C_PAD), row_map),
            scratch_shapes=[pltpu.VMEM((TM, H), jnp.float32)],
        ),
        compiler_params=pltpu.CompilerParams(
            dimension_semantics=sem, vmem_limit_bytes=vmem_limit),
        cost_estimate=pl.CostEstimate(
            flops=int(2 * nnz_blocks * TM * TK * H + 2 * n_pad * H * C_PAD),
            transcendentals=int(n_pad * C_PAD),
            bytes_accessed=int(nnz_blocks * (TM * TK + 2 * TK * H)
                               + n_pad * (4 * C_PAD + 4) + 4 * H * C_PAD)),
    )(bidx, bcnt, s, h_scaled, dinv, w2_pad, b2_pad)

    return out_pad[:N, :C]   # keep the slice adjacent: padded rows/lanes are garbage


def build_normalized_adjacency(edge_index, num_nodes):
    """Dense A_hat = D^{-1/2}(A + I)D^{-1/2} (same convention) for reference only."""
    src = np.asarray(edge_index[0]).astype(np.int64)
    dst = np.asarray(edge_index[1]).astype(np.int64)
    a = np.zeros((num_nodes, num_nodes), np.float32)
    a[src, dst] = 1.0
    a[dst, src] = 1.0
    idx = np.arange(num_nodes)
    a[idx, idx] = 1.0
    deg = a.sum(axis=1)
    dinv = np.where(deg > 0, 1.0 / np.sqrt(deg), 0.0).astype(np.float32)
    return jnp.asarray(a * dinv[:, None] * dinv[None, :])


if __name__ == "__main__":
    key = jax.random.PRNGKey(0)
    k_x, k_e, k_w1, k_w2 = jax.random.split(key, 4)

    N = 128      # number of nodes
    NFEAT = 32   # input feature dim
    NHID = 32    # hidden dim
    NCLASS = 8   # output classes
    E = 512      # number of edges

    x = jax.random.normal(k_x, (N, NFEAT), dtype=jnp.float32)
    edge_index = jax.random.randint(k_e, (2, E), 0, N, dtype=jnp.int32)

    w1 = jax.random.normal(k_w1, (NFEAT, NHID), jnp.float32) * (
        (2.0 / (NFEAT + NHID)) ** 0.5)
    b1 = jnp.zeros((NHID,), jnp.float32)
    w2 = jax.random.normal(k_w2, (NHID, NCLASS), jnp.float32) * (
        (2.0 / (NHID + NCLASS)) ** 0.5)
    b2 = jnp.zeros((NCLASS,), jnp.float32)

    out = basic_gnn_forward(x, edge_index, w1, b1, w2, b2)
    out = jax.block_until_ready(out)

    # Pure-JAX f32 reference (same graph convention) for numerics sanity.
    a_hat = build_normalized_adjacency(edge_index, N)
    h_ref = jax.nn.relu(a_hat @ (x @ w1) + b1)
    z_ref = (a_hat @ h_ref) @ w2 + b2
    ref = jax.nn.log_softmax(z_ref, axis=1)

    assert out.shape == (N, NCLASS)
    assert bool(jnp.all(jnp.isfinite(out)))
    row_sums = jnp.exp(out).sum(axis=1)
    assert bool(jnp.all(jnp.abs(row_sums - 1.0) < 1e-3))
    max_err = float(jnp.max(jnp.abs(out - ref)))
    assert max_err < 1e-1, f"max abs error vs f32 reference: {max_err}"

    print("KERNEL_OK")
</pallas_src>

<mosaic_0001>
module attributes {stable_mosaic.version = 11 : i64} {
  func.func @_linear_scale_kernel(%arg0: i32, %arg1: memref<256x32xf32, #tpu.memory_space<vmem>>, %arg2: memref<32x32xf32, #tpu.memory_space<vmem>>, %arg3: memref<256x1xf32, #tpu.memory_space<vmem>>, %arg4: memref<256x32xbf16, #tpu.memory_space<vmem>>) attributes {dimension_semantics = [#tpu.dimension_semantics<parallel>], iteration_bounds = array<i64: 1>, scalar_prefetch = 0 : i64, scratch_operands = 0 : i64, tpu.core_type = #tpu.core_type<tc>, window_params = [{transform_indices = @transform_0, window_bounds = array<i64: 256, 32>}, {pipeline_mode = #tpu.pipeline_mode<synchronous>, transform_indices = @transform_1, window_bounds = array<i64: 32, 32>}, {transform_indices = @transform_2, window_bounds = array<i64: 256, 1>}, {transform_indices = @transform_3, window_bounds = array<i64: 256, 32>}]} {
    %c0 = arith.constant 0 : index
    %c0_0 = arith.constant 0 : index
    %0 = vector.load %arg1[%c0, %c0_0] : memref<256x32xf32, #tpu.memory_space<vmem>>, vector<256x32xf32>
    %c0_1 = arith.constant 0 : index
    %c0_2 = arith.constant 0 : index
    %1 = vector.load %arg2[%c0_1, %c0_2] : memref<32x32xf32, #tpu.memory_space<vmem>>, vector<32x32xf32>
    %cst = arith.constant dense<0.000000e+00> : vector<256x32xf32>
    %2 = tpu.matmul %0, %1, %cst {dimension_numbers = #tpu.dot_dimension_numbers<[1], [0], [0], [1], [0, 0, 1, 1], [], []>} : vector<256x32xf32>, vector<32x32xf32>, vector<256x32xf32> -> vector<256x32xf32>
    %c0_3 = arith.constant 0 : index
    %c0_4 = arith.constant 0 : index
    %3 = vector.load %arg3[%c0_3, %c0_4] : memref<256x1xf32, #tpu.memory_space<vmem>>, vector<256x1xf32>
    %4 = vector.broadcast %3 : vector<256x1xf32> to vector<256x32xf32>
    %5 = arith.mulf %4, %2 : vector<256x32xf32>
    %6 = arith.truncf %5 : vector<256x32xf32> to vector<256x32xbf16>
    %c0_5 = arith.constant 0 : index
    %c0_6 = arith.constant 0 : index
    %7 = vector.load %arg4[%c0_5, %c0_6] : memref<256x32xbf16, #tpu.memory_space<vmem>>, vector<256x32xbf16>
    tpu.vector_store %arg4[%c0_5, %c0_6], %6 {strides = array<i32>} : memref<256x32xbf16, #tpu.memory_space<vmem>>, vector<256x32xbf16>,
    return
  }
  func.func @transform_0(%arg0: i32) -> (i32, i32) {
    %c0_i32 = arith.constant 0 : i32
    %c0_i32_0 = arith.constant 0 : i32
    return %arg0, %c0_i32 : i32, i32
  }
  func.func @transform_1(%arg0: i32) -> (i32, i32) {
    %c0_i32 = arith.constant 0 : i32
    %c0_i32_0 = arith.constant 0 : i32
    %c0_i32_1 = arith.constant 0 : i32
    return %c0_i32, %c0_i32_0 : i32, i32
  }
  func.func @transform_2(%arg0: i32) -> (i32, i32) {
    %c0_i32 = arith.constant 0 : i32
    %c0_i32_0 = arith.constant 0 : i32
    return %arg0, %c0_i32 : i32, i32
  }
  func.func @transform_3(%arg0: i32) -> (i32, i32) {
    %c0_i32 = arith.constant 0 : i32
    %c0_i32_0 = arith.constant 0 : i32
    return %arg0, %c0_i32 : i32, i32
  }
}

</mosaic_0001>

<bundles_post_ra>
// kernel: tpu_custom_call.1
= control target key start
LH: loop header
LB: loop body
LE: loop exit
PB: predicated region body
PF: predicated region fallthrough
CT: control target
= control target key end

     0   :  { %v964_v0 = vmov 0   ;;  %vm50_vm0 = vcmask 261120   ;;  %vm724_vm1 = vcmask 257024   ;;  %s1382_s1 = inlined_call_operand.vmem [shape: f32[32,32], index: 1, kind: input, shape index: {}]   ;;  %s1383_s2 = inlined_call_operand.vmem [shape: f32[256,1], index: 2, kind: input, shape index: {}]   ;;  %s1384_s0 = inlined_call_operand.vmem [shape: f32[256,32], index: 0, kind: input, shape index: {}]   ;;  %s1385_s3 = inlined_call_operand.vmem [shape: bf16[256,32], index: 3, kind: output, shape index: {}]  }
   0x1   :  { %963 = vset.pattern.permute.xlu1 %v964_v0  ;;  %962 = vset.pattern.permute.xlu0 %v964_v0  ;;  %v46_v1 = vld [vmem:[%s1382_s1] sm:$0xff]  ;;  %v47_v2 = vld [vmem:[%s1382_s1 + $0x8] sm:$0xff]  ;;  %v374_v3 = vld [vmem:[%s1383_s2 + $0x10] sm:$0xff] }
   0x2   :  { %v949_v4 = vpack.c.bf16 %v47_v2, %v46_v1  ;;  %416 = vperm.xlu1 %963, %v374_v3   ;;  %v372_v5 = vld [vmem:[%s1383_s2] sm:$0xff]  ;;  %v48_v6 = vld [vmem:[%s1382_s1 + $0x10] sm:$0xff]  ;;  %v49_v7 = vld [vmem:[%s1382_s1 + $0x18] sm:$0xff] }
   0x3   :  { %406 = vperm.xlu0 %962, %v372_v5   ;;  %v953_v8 = vpack.c.bf16 %v49_v7, %v48_v6  ;;  %v375_v9 = vld [vmem:[%s1383_s2 + $0x18] sm:$0xff]  ;;  %v373_v10 = vld [vmem:[%s1383_s2 + $0x8] sm:$0xff]  ;;  %v14_v11 = vld [vmem:[%s1384_s0] sm:$0xff] }
   0x4   :  { %950 = vmatprep.subr.bf16.mxu0 %v949_v4  ;;  %957 = vmatprep.subr.bf16.mxu1 %v949_v4  ;;  %v30_v12 = vld [vmem:[%s1384_s0 + $0x80] sm:$0xff]  ;;  %v377_v13 = vld [vmem:[%s1383_s2 + $0x28] sm:$0xff]  ;;  %v16_v17 = vld [vmem:[%s1384_s0 + $0x10] sm:$0xff] }
   0x5   :  { %952 = vmatpush3.bf16.msra.mxu0 %v949_v4  ;;  %959 = vmatpush3.bf16.msra.mxu1 %v949_v4  ;;  %v376_v14 = vld [vmem:[%s1383_s2 + $0x20] sm:$0xff]  ;;  %v15_v15 = vld [vmem:[%s1384_s0 + $0x8] sm:$0xff]  ;;  %v32_v18 = vld [vmem:[%s1384_s0 + $0x90] sm:$0xff] }
   0x6   :  { %954 = vmatprep.subr.bf16.mxu0 %v953_v8  ;;  %958 = vmatprep.subr.bf16.mxu1 %v953_v8  ;;  %v31_v16 = vld [vmem:[%s1384_s0 + $0x88] sm:$0xff]  ;;  %v379_v19 = vld [vmem:[%s1383_s2 + $0x38] sm:$0xff]  ;;  %v378_v20 = vld [vmem:[%s1383_s2 + $0x30] sm:$0xff] }
   0x7   :  { %421 = vperm.xlu1 %963, %v375_v9   ;;  %411 = vperm.xlu0 %962, %v373_v10   ;;  %v17_v21 = vld [vmem:[%s1384_s0 + $0x18] sm:$0xff]  ;;  %v18_v23 = vld [vmem:[%s1384_s0 + $0x20] sm:$0xff]  ;;  %v381_v25 = vld [vmem:[%s1383_s2 + $0x48] sm:$0xff] }
   0x8   :  { %901 = vmatprep.mubr.msk.f32.mxu0 %vm50_vm0, %v14_v11  ;;  %925 = vmatprep.mubr.msk.f32.mxu1 %vm50_vm0, %v30_v12  ;;  %v33_v22 = vld [vmem:[%s1384_s0 + $0x98] sm:$0xff]  ;;  %v34_v24 = vld [vmem:[%s1384_s0 + $0xa0] sm:$0xff]  ;;  %v19_v27 = vld [vmem:[%s1384_s0 + $0x28] sm:$0xff] }
   0x9   :  { %956 = vmatpush3.bf16.msra.mxu0 %v953_v8  ;;  %960 = vmatpush3.bf16.msra.mxu1 %v953_v8  ;;  %v380_v26 = vld [vmem:[%s1383_s2 + $0x40] sm:$0xff]  ;;  %v35_v28 = vld [vmem:[%s1384_s0 + $0xa8] sm:$0xff]  ;;  %v20_v29 = vld [vmem:[%s1384_s0 + $0x30] sm:$0xff] }
   0xa   :  { %v36_v30 = vld [vmem:[%s1384_s0 + $0xb0] sm:$0xff]  ;;  %v383_v31 = vld [vmem:[%s1383_s2 + $0x58] sm:$0xff]  ;;  %v22_v35 = vld [vmem:[%s1384_s0 + $0x40] sm:$0xff] }
   0xb   :  { %431 = vperm.xlu1 %963, %v377_v13   ;;  %426 = vperm.xlu0 %962, %v376_v14   ;;  %v382_v32 = vld [vmem:[%s1383_s2 + $0x50] sm:$0xff]  ;;  %v21_v33 = vld [vmem:[%s1384_s0 + $0x38] sm:$0xff]  ;;  %v38_v36 = vld [vmem:[%s1384_s0 + $0xc0] sm:$0xff] }
   0xc   :  { %902 = vmatmul.mubr.msk.f32.vlgmr.msra.gmra.mrb[0].mxu0 %vm50_vm0, %v15_v15  ;;  %926 = vmatmul.mubr.msk.f32.vlgmr.msra.gmra.mrb[0].mxu1 %vm50_vm0, %v31_v16  ;;  %v37_v34 = vld [vmem:[%s1384_s0 + $0xb8] sm:$0xff]  ;;  %v385_v37 = vld [vmem:[%s1383_s2 + $0x68] sm:$0xff]  ;;  %v384_v38 = vld [vmem:[%s1383_s2 + $0x60] sm:$0xff] }
   0xd   :  { %904 = vmatprep.mubr.msk.f32.mxu0 %vm50_vm0, %v16_v17  ;;  %928 = vmatprep.mubr.msk.f32.mxu1 %vm50_vm0, %v32_v18  ;;  %v23_v39 = vld [vmem:[%s1384_s0 + $0x48] sm:$0xff]  ;;  %v24_v41 = vld [vmem:[%s1384_s0 + $0x50] sm:$0xff]  ;;  %v387_v43 = vld [vmem:[%s1383_s2 + $0x78] sm:$0xff] }
   0xe   :  { %v39_v40 = vld [vmem:[%s1384_s0 + $0xc8] sm:$0xff]  ;;  %v40_v42 = vld [vmem:[%s1384_s0 + $0xd0] sm:$0xff]  ;;  %v25_v45 = vld [vmem:[%s1384_s0 + $0x58] sm:$0xff] }
   0xf   :  { %441 = vperm.xlu1 %963, %v379_v19   ;;  %436 = vperm.xlu0 %962, %v378_v20   ;;  %v386_v44 = vld [vmem:[%s1383_s2 + $0x70] sm:$0xff]  ;;  %v41_v46 = vld [vmem:[%s1384_s0 + $0xd8] sm:$0xff]  ;;  %v26_v47 = vld [vmem:[%s1384_s0 + $0x60] sm:$0xff] }
  0x10   :  { %905 = vmatmul.mubr.msk.f32.gmra.mrb[2].mxu0 %vm50_vm0, %v17_v21  ;;  %929 = vmatmul.mubr.msk.f32.gmra.mrb[2].mxu1 %vm50_vm0, %v33_v22  ;;  %v42_v48 = vld [vmem:[%s1384_s0 + $0xe0] sm:$0xff]  ;;  %v389_v49 = vld [vmem:[%s1383_s2 + $0x88] sm:$0xff]  ;;  %v28_v53 = vld [vmem:[%s1384_s0 + $0x70] sm:$0xff] }
  0x11   :  { %907 = vmatprep.mubr.msk.f32.mxu0 %vm50_vm0, %v18_v23  ;;  %931 = vmatprep.mubr.msk.f32.mxu1 %vm50_vm0, %v34_v24  ;;  %v388_v50 = vld [vmem:[%s1383_s2 + $0x80] sm:$0xff]  ;;  %v27_v51 = vld [vmem:[%s1384_s0 + $0x68] sm:$0xff]  ;;  %v44_v54 = vld [vmem:[%s1384_s0 + $0xf0] sm:$0xff] }
  0x12   :  { %v43_v52 = vld [vmem:[%s1384_s0 + $0xe8] sm:$0xff]  ;;  %v391_v55 = vld [vmem:[%s1383_s2 + $0x98] sm:$0xff]  ;;  %v390_v56 = vld [vmem:[%s1383_s2 + $0x90] sm:$0xff] }
  0x13   :  { %451 = vperm.xlu1 %963, %v381_v25   ;;  %446 = vperm.xlu0 %962, %v380_v26   ;;  %v29_v57 = vld [vmem:[%s1384_s0 + $0x78] sm:$0xff]  ;;  %v393_v59 = vld [vmem:[%s1383_s2 + $0xa8] sm:$0xff]  ;;  %v392_v60 = vld [vmem:[%s1383_s2 + $0xa0] sm:$0xff] }
  0x14   :  { %908 = vmatmul.mubr.msk.f32.gmra.mrb[4].mxu0 %vm50_vm0, %v19_v27  ;;  %932 = vmatmul.mubr.msk.f32.gmra.mrb[4].mxu1 %vm50_vm0, %v35_v28  ;;  %v45_v58 = vld [vmem:[%s1384_s0 + $0xf8] sm:$0xff]  ;;  %v394_v62 = vld [vmem:[%s1383_s2 + $0xb0] sm:$0xff]  ;;  %v397_v63 = vld [vmem:[%s1383_s2 + $0xc8] sm:$0xff] }
  0x15   :  { %910 = vmatprep.mubr.msk.f32.mxu0 %vm50_vm0, %v20_v29  ;;  %934 = vmatprep.mubr.msk.f32.mxu1 %vm50_vm0, %v36_v30  ;;  %v395_v61 = vld [vmem:[%s1383_s2 + $0xb8] sm:$0xff]  ;;  %v396_v0 = vld [vmem:[%s1383_s2 + $0xc0] sm:$0xff]  ;;  %v398_v2 = vld [vmem:[%s1383_s2 + $0xd0] sm:$0xff] }
  0x16   :  { %v399_v1 = vld [vmem:[%s1383_s2 + $0xd8] sm:$0xff]  ;;  %v401_v3 = vld [vmem:[%s1383_s2 + $0xe8] sm:$0xff]  ;;  %v400_v4 = vld [vmem:[%s1383_s2 + $0xe0] sm:$0xff] }
  0x17   :  { %461 = vperm.xlu1 %963, %v383_v31   ;;  %456 = vperm.xlu0 %962, %v382_v32   ;;  %v403_v5 = vld [vmem:[%s1383_s2 + $0xf8] sm:$0xff]  ;;  %v402_v6 = vld [vmem:[%s1383_s2 + $0xf0] sm:$0xff] }
  0x18   :  { %911 = vmatmul.mubr.msk.f32.gmra.mrb[6].mxu0 %vm50_vm0, %v21_v33  ;;  %935 = vmatmul.mubr.msk.f32.gmra.mrb[6].mxu1 %vm50_vm0, %v37_v34 }
  0x19   :  { %913 = vmatprep.mubr.msk.f32.mxu0 %vm50_vm0, %v22_v35  ;;  %937 = vmatprep.mubr.msk.f32.mxu1 %vm50_vm0, %v38_v36 }
  0x1b   :  { %471 = vperm.xlu1 %963, %v385_v37   ;;  %466 = vperm.xlu0 %962, %v384_v38  }
  0x1c   :  { %914 = vmatmul.mubr.msk.f32.gmra.mrb[8].mxu0 %vm50_vm0, %v23_v39  ;;  %938 = vmatmul.mubr.msk.f32.gmra.mrb[8].mxu1 %vm50_vm0, %v39_v40 }
  0x1d   :  { %916 = vmatprep.mubr.msk.f32.mxu0 %vm50_vm0, %v24_v41  ;;  %940 = vmatprep.mubr.msk.f32.mxu1 %vm50_vm0, %v40_v42 }
  0x1f   :  { %481 = vperm.xlu1 %963, %v387_v43   ;;  %476 = vperm.xlu0 %962, %v386_v44  }
  0x20   :  { %917 = vmatmul.mubr.msk.f32.gmra.mrb[10].mxu0 %vm50_vm0, %v25_v45  ;;  %941 = vmatmul.mubr.msk.f32.gmra.mrb[10].mxu1 %vm50_vm0, %v41_v46 }
  0x21   :  { %919 = vmatprep.mubr.msk.f32.mxu0 %vm50_vm0, %v26_v47  ;;  %943 = vmatprep.mubr.msk.f32.mxu1 %vm50_vm0, %v42_v48 }
  0x23   :  { %491 = vperm.xlu1 %963, %v389_v49   ;;  %486 = vperm.xlu0 %962, %v388_v50  }
  0x24   :  { %920 = vmatmul.mubr.msk.f32.gmra.mrb[12].mxu0 %vm50_vm0, %v27_v51  ;;  %944 = vmatmul.mubr.msk.f32.gmra.mrb[12].mxu1 %vm50_vm0, %v43_v52 }
  0x25   :  { %922 = vmatprep.mubr.msk.f32.mxu0 %vm50_vm0, %v28_v53  ;;  %946 = vmatprep.mubr.msk.f32.mxu1 %vm50_vm0, %v44_v54 }
  0x27   :  { %501 = vperm.xlu1 %963, %v391_v55   ;;  %496 = vperm.xlu0 %962, %v390_v56  }
  0x28   :  { %923 = vmatmul.mubr.msk.f32.gmra.mrb[14].mxu0 %vm50_vm0, %v29_v57  ;;  %947 = vmatmul.mubr.msk.f32.gmra.mrb[14].mxu1 %vm50_vm0, %v45_v58 }
  0x2b   :  { %511 = vperm.xlu1 %963, %v393_v59   ;;  %506 = vperm.xlu0 %962, %v392_v60  }
  0x2f   :  { %521 = vperm.xlu1 %963, %v395_v61   ;;  %516 = vperm.xlu0 %962, %v394_v62  }
  0x33   :  { %531 = vperm.xlu1 %963, %v397_v63   ;;  %526 = vperm.xlu0 %962, %v396_v0  }
  0x37   :  { %541 = vperm.xlu1 %963, %v399_v1   ;;  %536 = vperm.xlu0 %962, %v398_v2  }
  0x3b   :  { %551 = vperm.xlu1 %963, %v401_v3   ;;  %546 = vperm.xlu0 %962, %v400_v4  }
  0x3f   :  { %561 = vperm.xlu1 %963, %v403_v5   ;;  %556 = vperm.xlu0 %962, %v402_v6  }
  0x81   :  { %v417_v7 = vpop.permute.xlu1 %416 }
  0x82   :  { %v407_v8 = vpop.permute.xlu0 %406 }
  0x86   :  { %v422_v9 = vpop.permute.xlu1 %421  ;;  %v412_v10 = vpop.permute.xlu0 %411 }
  0x8a   :  { %v432_v11 = vpop.permute.xlu1 %431  ;;  %v427_v12 = vpop.permute.xlu0 %426 }
  0x8e   :  { %v1221_v13 = vpop.permute.xlu1 %441  ;;  %v1223_v14 = vpop.permute.xlu0 %436 }
  0x92   :  { %v1225_v15 = vpop.permute.xlu1 %451  ;;  %v1227_v16 = vpop.permute.xlu0 %446 }
  0x96   :  { %v1229_v17 = vpop.permute.xlu1 %461  ;;  %v1231_v18 = vpop.permute.xlu0 %456 }
  0x9a   :  { %v1233_v19 = vpop.permute.xlu1 %471  ;;  %v1235_v20 = vpop.permute.xlu0 %466 }
  0x9e   :  { %v1237_v21 = vpop.permute.xlu1 %481  ;;  %v1239_v22 = vpop.permute.xlu0 %476 }
  0xa2   :  { %v492_v23 = vpop.permute.xlu1 %491  ;;  %v487_v24 = vpop.permute.xlu0 %486 }
  0xa6   :  { %v502_v25 = vpop.permute.xlu1 %501  ;;  %v497_v26 = vpop.permute.xlu0 %496 }
  0xaa   :  { %v512_v27 = vpop.permute.xlu1 %511  ;;  %v507_v28 = vpop.permute.xlu0 %506 }
  0xae   :  { %v522_v29 = vpop.permute.xlu1 %521  ;;  %v517_v30 = vpop.permute.xlu0 %516 }
  0xb2   :  { %v532_v39 = vpop.permute.xlu1 %531  ;;  %v1241_v40 = vpop.permute.xlu0 %526 }
  0xb6   :  { %v542_v1 = vpop.permute.xlu1 %541  ;;  %v537_v2 = vpop.permute.xlu0 %536 }
  0xdf   :  { %v903_v31 = vpop.f32.mrb[0].mxu0  ;;  %v927_v32 = vpop.f32.mrb[0].mxu1 }
  0xe0   :  { %v565_v33 = vmul.f32 %v903_v31, %v412_v10  ;;  %v581_v34 = vmul.f32 %v927_v32, %v492_v23  ;;  %v213_v35 = vpop.f32.mrb[1].mxu0  ;;  %v293_v36 = vpop.f32.mrb[1].mxu1 }
  0xe1   :  { %v564_v37 = vmul.f32 %v407_v8, %v213_v35  ;;  %v580_v38 = vmul.f32 %v487_v24, %v293_v36  ;;  %v552_v35 = vpop.permute.xlu1 %551  ;;  %v547_v36 = vpop.permute.xlu0 %546 }
  0xe2   :  { %v826_v41 = vpack.c.bf16 %v565_v33, %v565_v33  ;;  %v842_v42 = vpack.c.bf16 %v581_v34, %v581_v34 }
  0xe3   :  { %v825_v43 = vpack.c.bf16 %v564_v37, %v564_v37  ;;  %v841_v44 = vpack.c.bf16 %v580_v38, %v580_v38  ;;  %v906_v45 = vpop.f32.mrb[2].mxu0  ;;  %v930_v46 = vpop.f32.mrb[2].mxu1 }
  0xe4   :  { %726 = vst.msk [vmem:[%s1385_s3 + $0x4] sm:$0xf] %vm724_vm1, %v826_v41  ;;  %742 = vst.msk [vmem:[%s1385_s3 + $0x44] sm:$0xf] %vm724_vm1, %v842_v42  ;;  %v567_v47 = vmul.f32 %v906_v45, %v422_v9  ;;  %v583_v48 = vmul.f32 %v930_v46, %v502_v25  ;;  %v223_v49 = vpop.f32.mrb[3].mxu0  ;;  %v303_v50 = vpop.f32.mrb[3].mxu1 }
  0xe5   :  { %725 = vst.msk [vmem:[%s1385_s3] sm:$0xf] %vm724_vm1, %v825_v43  ;;  %741 = vst.msk [vmem:[%s1385_s3 + $0x40] sm:$0xf] %vm724_vm1, %v841_v44  ;;  %v566_v51 = vmul.f32 %v417_v7, %v223_v49  ;;  %v582_v52 = vmul.f32 %v497_v26, %v303_v50 }
  0xe6   :  { %v828_v53 = vpack.c.bf16 %v567_v47, %v567_v47  ;;  %v844_v54 = vpack.c.bf16 %v583_v48, %v583_v48 }
  0xe7   :  { %v827_v55 = vpack.c.bf16 %v566_v51, %v566_v51  ;;  %v843_v56 = vpack.c.bf16 %v582_v52, %v582_v52  ;;  %v909_v57 = vpop.f32.mrb[4].mxu0  ;;  %v933_v58 = vpop.f32.mrb[4].mxu1 }
  0xe8   :  { %728 = vst.msk [vmem:[%s1385_s3 + $0xc] sm:$0xf] %vm724_vm1, %v828_v53  ;;  %744 = vst.msk [vmem:[%s1385_s3 + $0x4c] sm:$0xf] %vm724_vm1, %v844_v54  ;;  %v569_v59 = vmul.f32 %v909_v57, %v432_v11  ;;  %v585_v60 = vmul.f32 %v933_v58, %v512_v27  ;;  %v233_v61 = vpop.f32.mrb[5].mxu0  ;;  %v313_v62 = vpop.f32.mrb[5].mxu1 }
  0xe9   :  { %727 = vst.msk [vmem:[%s1385_s3 + $0x8] sm:$0xf] %vm724_vm1, %v827_v55  ;;  %743 = vst.msk [vmem:[%s1385_s3 + $0x48] sm:$0xf] %vm724_vm1, %v843_v56  ;;  %v568_v63 = vmul.f32 %v427_v12, %v233_v61  ;;  %v584_v0 = vmul.f32 %v507_v28, %v313_v62  ;;  %v562_v57 = vpop.permute.xlu1 %561  ;;  %v557_v58 = vpop.permute.xlu0 %556 }
  0xea   :  { %v830_v3 = vpack.c.bf16 %v569_v59, %v569_v59  ;;  %v846_v4 = vpack.c.bf16 %v585_v60, %v585_v60 }
  0xeb   :  { %v829_v5 = vpack.c.bf16 %v568_v63, %v568_v63  ;;  %v845_v6 = vpack.c.bf16 %v584_v0, %v584_v0  ;;  %v912_v7 = vpop.f32.mrb[6].mxu0  ;;  %v936_v8 = vpop.f32.mrb[6].mxu1 }
  0xec   :  { %730 = vst.msk [vmem:[%s1385_s3 + $0x14] sm:$0xf] %vm724_vm1, %v830_v3  ;;  %746 = vst.msk [vmem:[%s1385_s3 + $0x54] sm:$0xf] %vm724_vm1, %v846_v4  ;;  %v571_v9 = vmul.f32 %v912_v7, %v1221_v13  ;;  %v587_v10 = vmul.f32 %v936_v8, %v522_v29  ;;  %v243_v11 = vpop.f32.mrb[7].mxu0  ;;  %v323_v12 = vpop.f32.mrb[7].mxu1 }
  0xed   :  { %729 = vst.msk [vmem:[%s1385_s3 + $0x10] sm:$0xf] %vm724_vm1, %v829_v5  ;;  %745 = vst.msk [vmem:[%s1385_s3 + $0x50] sm:$0xf] %vm724_vm1, %v845_v6  ;;  %v570_v23 = vmul.f32 %v1223_v14, %v243_v11  ;;  %v586_v24 = vmul.f32 %v517_v30, %v323_v12 }
  0xee   :  { %v832_v25 = vpack.c.bf16 %v571_v9, %v571_v9  ;;  %v848_v26 = vpack.c.bf16 %v587_v10, %v587_v10 }
  0xef   :  { %v831_v27 = vpack.c.bf16 %v570_v23, %v570_v23  ;;  %v847_v13 = vpack.c.bf16 %v586_v24, %v586_v24  ;;  %v915_v28 = vpop.f32.mrb[8].mxu0  ;;  %v939_v29 = vpop.f32.mrb[8].mxu1 }
  0xf0   :  { %732 = vst.msk [vmem:[%s1385_s3 + $0x1c] sm:$0xf] %vm724_vm1, %v832_v25  ;;  %748 = vst.msk [vmem:[%s1385_s3 + $0x5c] sm:$0xf] %vm724_vm1, %v848_v26  ;;  %v573_v31 = vmul.f32 %v915_v28, %v1225_v15  ;;  %v589_v14 = vmul.f32 %v939_v29, %v532_v39  ;;  %v253_v30 = vpop.f32.mrb[9].mxu0  ;;  %v333_v32 = vpop.f32.mrb[9].mxu1 }
  0xf1   :  { %731 = vst.msk [vmem:[%s1385_s3 + $0x18] sm:$0xf] %vm724_vm1, %v831_v27  ;;  %747 = vst.msk [vmem:[%s1385_s3 + $0x58] sm:$0xf] %vm724_vm1, %v847_v13  ;;  %v572_v33 = vmul.f32 %v1227_v16, %v253_v30  ;;  %v588_v34 = vmul.f32 %v1241_v40, %v333_v32 }
  0xf2   :  { %v834_v15 = vpack.c.bf16 %v573_v31, %v573_v31  ;;  %v850_v37 = vpack.c.bf16 %v589_v14, %v589_v14 }
  0xf3   :  { %v833_v38 = vpack.c.bf16 %v572_v33, %v572_v33  ;;  %v849_v39 = vpack.c.bf16 %v588_v34, %v588_v34  ;;  %v918_v41 = vpop.f32.mrb[10].mxu0  ;;  %v942_v42 = vpop.f32.mrb[10].mxu1 }
  0xf4   :  { %734 = vst.msk [vmem:[%s1385_s3 + $0x24] sm:$0xf] %vm724_vm1, %v834_v15  ;;  %750 = vst.msk [vmem:[%s1385_s3 + $0x64] sm:$0xf] %vm724_vm1, %v850_v37  ;;  %v575_v16 = vmul.f32 %v918_v41, %v1229_v17  ;;  %v591_v40 = vmul.f32 %v942_v42, %v542_v1  ;;  %v263_v43 = vpop.f32.mrb[11].mxu0  ;;  %v343_v44 = vpop.f32.mrb[11].mxu1 }
  0xf5   :  { %733 = vst.msk [vmem:[%s1385_s3 + $0x20] sm:$0xf] %vm724_vm1, %v833_v38  ;;  %749 = vst.msk [vmem:[%s1385_s3 + $0x60] sm:$0xf] %vm724_vm1, %v849_v39  ;;  %v574_v45 = vmul.f32 %v1231_v18, %v263_v43  ;;  %v590_v46 = vmul.f32 %v537_v2, %v343_v44 }
  0xf6   :  { %v836_v47 = vpack.c.bf16 %v575_v16, %v575_v16  ;;  %v852_v48 = vpack.c.bf16 %v591_v40, %v591_v40 }
  0xf7   :  { %v835_v49 = vpack.c.bf16 %v574_v45, %v574_v45  ;;  %v851_v17 = vpack.c.bf16 %v590_v46, %v590_v46  ;;  %v921_v50 = vpop.f32.mrb[12].mxu0  ;;  %v945_v51 = vpop.f32.mrb[12].mxu1 }
  0xf8   :  { %736 = vst.msk [vmem:[%s1385_s3 + $0x2c] sm:$0xf] %vm724_vm1, %v836_v47  ;;  %752 = vst.msk [vmem:[%s1385_s3 + $0x6c] sm:$0xf] %vm724_vm1, %v852_v48  ;;  %v577_v52 = vmul.f32 %v921_v50, %v1233_v19  ;;  %v593_v18 = vmul.f32 %v945_v51, %v552_v35  ;;  %v273_v53 = vpop.f32.mrb[13].mxu0  ;;  %v353_v54 = vpop.f32.mrb[13].mxu1 }
  0xf9   :  { %735 = vst.msk [vmem:[%s1385_s3 + $0x28] sm:$0xf] %vm724_vm1, %v835_v49  ;;  %751 = vst.msk [vmem:[%s1385_s3 + $0x68] sm:$0xf] %vm724_vm1, %v851_v17  ;;  %v576_v55 = vmul.f32 %v1235_v20, %v273_v53  ;;  %v592_v56 = vmul.f32 %v547_v36, %v353_v54 }
  0xfa   :  { %v838_v59 = vpack.c.bf16 %v577_v52, %v577_v52  ;;  %v854_v19 = vpack.c.bf16 %v593_v18, %v593_v18 }
  0xfb   :  { %v837_v60 = vpack.c.bf16 %v576_v55, %v576_v55  ;;  %v853_v61 = vpack.c.bf16 %v592_v56, %v592_v56  ;;  %v924_v62 = vpop.f32.mrb[14].mxu0  ;;  %v948_v63 = vpop.f32.mrb[14].mxu1 }
  0xfc   :  { %738 = vst.msk [vmem:[%s1385_s3 + $0x34] sm:$0xf] %vm724_vm1, %v838_v59  ;;  %754 = vst.msk [vmem:[%s1385_s3 + $0x74] sm:$0xf] %vm724_vm1, %v854_v19  ;;  %v579_v20 = vmul.f32 %v924_v62, %v1237_v21  ;;  %v595_v0 = vmul.f32 %v948_v63, %v562_v57  ;;  %v283_v1 = vpop.f32.mrb[15].mxu0  ;;  %v363_v2 = vpop.f32.mrb[15].mxu1 }
  0xfd   :  { %737 = vst.msk [vmem:[%s1385_s3 + $0x30] sm:$0xf] %vm724_vm1, %v837_v60  ;;  %753 = vst.msk [vmem:[%s1385_s3 + $0x70] sm:$0xf] %vm724_vm1, %v853_v61  ;;  %v578_v3 = vmul.f32 %v1239_v22, %v283_v1  ;;  %v594_v4 = vmul.f32 %v557_v58, %v363_v2 }
  0xfe   :  { %v840_v5 = vpack.c.bf16 %v579_v20, %v579_v20  ;;  %v856_v6 = vpack.c.bf16 %v595_v0, %v595_v0 }
  0xff   :  { %v839_v7 = vpack.c.bf16 %v578_v3, %v578_v3  ;;  %v855_v21 = vpack.c.bf16 %v594_v4, %v594_v4 }
 0x100   :  { %740 = vst.msk [vmem:[%s1385_s3 + $0x3c] sm:$0xf] %vm724_vm1, %v840_v5  ;;  %756 = vst.msk [vmem:[%s1385_s3 + $0x7c] sm:$0xf] %vm724_vm1, %v856_v6 }
 0x101   :  { %739 = vst.msk [vmem:[%s1385_s3 + $0x38] sm:$0xf] %vm724_vm1, %v839_v7  ;;  %755 = vst.msk [vmem:[%s1385_s3 + $0x78] sm:$0xf] %vm724_vm1, %v855_v21 }

</bundles_post_ra>
